<compile_context>
chip_gen: v7x
topology: tpu7x:2x2x1
jax: 0.10.0
libtpu: 0.0.40
codegen_flags: <defaults>
</compile_context>

<pallas_src>
import functools

import jax
import jax.numpy as jnp
from jax import lax
from jax.experimental import pallas as pl
from jax.experimental.pallas import tpu as pltpu

BN_EPS = 1e-5

# Fused single-block path only if the whole problem (x + out + params) fits in
# this many bytes of VMEM -- byte-based, so it is inputSize-aware.
_FUSED_BYTES_MAX = 1 * 1024 * 1024

# Tiled path: budget for the double-buffered x/out tiles of pass 2 (well under
# v7x's 32 MiB scoped default / 64 MiB physical VMEM).
_TILE_VMEM_BUDGET = 16 * 1024 * 1024
_VMEM_LIMIT_BYTES = 32 * 1024 * 1024
_MAX_ROW_TILE = 8192
_STATS_CHUNKS = 2          # leading "parallel" axis of the stats grid (v7x megacore)


def _round_up(x, m):
    return (x + m - 1) // m * m


# ---------------------------------------------------------------------------
# Kernels
# ---------------------------------------------------------------------------
def _fused_bn_linear_kernel(scal_ref, x_ref, wt_ref, csum_ref, b_ref, o_ref):
    """Single-block fused BN (training-mode batch stats) + Linear.

    scal_ref: SMEM (3,) f32 = [gamma, beta, 1/(N*D_in)]
    x_ref   : (N, D_in)       raw input rows
    wt_ref  : (D_in, D_out)   weight^T
    csum_ref: (1, D_out)      column sums of W^T (folded BN shift)
    b_ref   : (1, D_out)      bias
    o_ref   : (N, D_out)      unpadded output
    """
    gamma = scal_ref[0]
    beta = scal_ref[1]
    inv_n = scal_ref[2]

    x = x_ref[...].astype(jnp.float32)

    # MXU matmul on the *raw* input: independent of the statistics chain below,
    # so the vmatmul pushes overlap the XLU/VPU reduction work.
    y = jnp.dot(x.astype(wt_ref.dtype), wt_ref[...],
                preferred_element_type=jnp.float32)

    # Exact (centered) batch statistics: x already lives in VMEM, so the second
    # traversal is HBM-free and avoids E[x^2]-mean^2 cancellation.
    mean = jnp.sum(x) * inv_n
    d = x - mean
    var = jnp.sum(d * d) * inv_n
    a = gamma * lax.rsqrt(var + BN_EPS)    # BN scale folded into epilogue
    c = beta - mean * a                    # BN shift folded into epilogue

    o_ref[...] = (y * a + (c * csum_ref[...] + b_ref[...])).astype(o_ref.dtype)


def _stats_kernel(nrows_ref, x_ref, s_ref, ss_ref):
    """Pass 1 of the tiled path: per-column sum / sum-of-squares partials.

    Grid = (stats_chunks, tiles_per_chunk); the leading axis is "parallel"
    (each v7x TensorCore sweeps half of the rows), the trailing axis
    accumulates into this chunk's (1, D_in) partial.  Rows past the true batch
    size are masked out in-kernel, so x never needs HBM-side padding.
    """
    @pl.when(pl.program_id(1) == 0)
    def _():
        s_ref[...] = jnp.zeros_like(s_ref)
        ss_ref[...] = jnp.zeros_like(ss_ref)

    tile_rows = x_ref.shape[0]
    # Global (unclamped) tile index; the x index_map clamps the DMA to stay in
    # bounds, and this mask zeroes any duplicated / out-of-range rows.
    tile_idx = pl.program_id(0) * pl.num_programs(1) + pl.program_id(1)
    row0 = tile_idx * tile_rows

    x = x_ref[...].astype(jnp.float32)
    rows = lax.broadcasted_iota(jnp.int32, x.shape, 0) + row0
    x = jnp.where(rows < nrows_ref[0], x, 0.0)

    s_ref[...] += jnp.sum(x, axis=0, keepdims=True)
    ss_ref[...] += jnp.sum(x * x, axis=0, keepdims=True)


def _tiled_bn_linear_kernel(a_ref, x_ref, wt_ref, shift_ref, o_ref):
    """Pass 2 of the tiled path: matmul on raw x + pre-folded affine epilogue.

    a_ref    : SMEM (1,) f32  = gamma / sqrt(var + eps)
    shift_ref: (1, D_out) f32 = (beta - mean*a) * colsum(W^T) + bias
    """
    a = a_ref[0]
    y = jnp.dot(x_ref[...].astype(wt_ref.dtype), wt_ref[...],
                preferred_element_type=jnp.float32)
    o_ref[...] = (y * a + shift_ref[...]).astype(o_ref.dtype)


# ---------------------------------------------------------------------------
# Wrapper
# ---------------------------------------------------------------------------
def prepare_linear_params(w, b, *, mxu_dtype=jnp.float32):
    """One-time Linear-parameter prep (keep OUT of the per-step forward path).

    Transposes the weight once and precomputes colsum(W^T) for the folded BN
    shift.  Pass mxu_dtype=jnp.bfloat16 on v6e/v7x to halve weight HBM traffic
    and use the fast MXU path (accumulation stays f32 inside the kernels).
    """
    wt = jnp.asarray(w, jnp.float32).T                       # (D_in, D_out)
    csum = jnp.sum(wt, axis=0, keepdims=True)                # (1, D_out) f32
    bias = jnp.asarray(b, jnp.float32).reshape(1, -1)        # (1, D_out) f32
    return wt.astype(mxu_dtype), csum, bias


@functools.partial(jax.jit, static_argnames=("row_tile",))
def linear_regression_forward(x_ncl, gamma, beta, wt, csum, bias, *, row_tile=0):
    """x_ncl: (N, 1, D_in) -> (N, 1, D_out)  (torch NCL layout).

    row_tile=0: auto (byte-gated fused block for small problems, row-tiled
    two-pass for large ones).  row_tile>0: force the tiled path with that tile.
    """
    N, C, D_in = x_ncl.shape
    assert C == 1, "BatchNorm1d(num_features=1) requires channel dim == 1"
    D_out = wt.shape[1]
    out_dtype = x_ncl.dtype

    x2d = x_ncl.reshape(N, D_in)
    inv_n = 1.0 / float(N * D_in)
    g = jnp.asarray(gamma, jnp.float32).reshape(())
    be = jnp.asarray(beta, jnp.float32).reshape(())

    fused_bytes = (N * D_in * x2d.dtype.itemsize
                   + N * D_out * jnp.dtype(out_dtype).itemsize
                   + wt.size * wt.dtype.itemsize + 8 * D_out)

    if row_tile == 0 and fused_bytes <= _FUSED_BYTES_MAX:
        # Whole problem fits comfortably in one VMEM block: fully fused kernel
        # (stats + matmul + epilogue), one pass over x.
        scal = jnp.concatenate([g.reshape(1), be.reshape(1),
                                jnp.full((1,), inv_n, jnp.float32)])
        out = pl.pallas_call(
            _fused_bn_linear_kernel,
            out_shape=jax.ShapeDtypeStruct((N, D_out), out_dtype),
            in_specs=[
                pl.BlockSpec(memory_space=pltpu.SMEM),        # [gamma, beta, 1/n]
                pl.BlockSpec((N, D_in), lambda: (0, 0)),      # x
                pl.BlockSpec((D_in, D_out), lambda: (0, 0)),  # W^T
                pl.BlockSpec((1, D_out), lambda: (0, 0)),     # colsum(W^T)
                pl.BlockSpec((1, D_out), lambda: (0, 0)),     # bias
            ],
            out_specs=pl.BlockSpec((N, D_out), lambda: (0, 0)),
        )(scal, x2d, wt, csum, bias)
        return out.reshape(N, 1, D_out)

    # ------------------ Row-tiled two-pass path (pipelined) ------------------
    if row_tile > 0:
        tile_n = row_tile
    else:
        # Size the tile from a VMEM byte budget (double-buffered x-in + out
        # tiles plus the resident W^T); keeps each grid step's HBM traffic
        # >= ~1 MiB so the fixed per-step pipeline overhead is amortized.
        per_row = 2 * (D_in * x2d.dtype.itemsize
                       + D_out * jnp.dtype(out_dtype).itemsize)
        budget = _TILE_VMEM_BUDGET - 2 * wt.size * wt.dtype.itemsize
        tile_n = max(256, budget // max(per_row, 1))
    tile_n = max(8, min(_round_up(tile_n, 8), _MAX_ROW_TILE, _round_up(N, 8)))

    n_tiles = pl.cdiv(N, tile_n)
    stats_chunks = _STATS_CHUNKS if n_tiles >= _STATS_CHUNKS else 1
    chunk_tiles = pl.cdiv(n_tiles, stats_chunks)
    last_tile = n_tiles - 1

    # ---- Pass 1: per-chunk partial column sums / sums-of-squares over x ----
    nrows = jnp.full((1,), N, jnp.int32)

    def x_stats_map(c, i):
        # Clamp so the DMA never starts past the array; duplicated/overshoot
        # tiles are zeroed by the in-kernel row mask.
        return (jnp.minimum(c * chunk_tiles + i, last_tile), 0)

    part_s, part_ss = pl.pallas_call(
        _stats_kernel,
        out_shape=(jax.ShapeDtypeStruct((stats_chunks, 1, D_in), jnp.float32),
                   jax.ShapeDtypeStruct((stats_chunks, 1, D_in), jnp.float32)),
        grid=(stats_chunks, chunk_tiles),
        in_specs=[
            pl.BlockSpec(memory_space=pltpu.SMEM),              # true row count
            pl.BlockSpec((tile_n, D_in), x_stats_map),          # x row tile
        ],
        out_specs=(pl.BlockSpec((None, 1, D_in), lambda c, i: (c, 0, 0)),
                   pl.BlockSpec((None, 1, D_in), lambda c, i: (c, 0, 0))),
        compiler_params=pltpu.CompilerParams(
            dimension_semantics=("parallel", "arbitrary"),
            vmem_limit_bytes=_VMEM_LIMIT_BYTES),
    )(nrows, x2d)

    # ---- Finalize statistics + fold the affine (tiny XLA ops, hoisted out of
    # the per-tile kernel) ----
    s = jnp.sum(part_s)
    ss = jnp.sum(part_ss)
    mean = s * inv_n
    # TODO(synk): E[x^2]-mean^2 in f32 can cancel for strongly off-center data;
    # a Welford/Chan per-chunk combine in pass 1 would fix this if needed.
    var = jnp.maximum(ss * inv_n - mean * mean, 0.0)
    a = g * lax.rsqrt(var + BN_EPS)
    c = be - mean * a
    shift = (c * csum + bias).astype(jnp.float32)               # (1, D_out)

    # ---- Pass 2: matmul on raw x + folded epilogue, independent row tiles ---
    out = pl.pallas_call(
        _tiled_bn_linear_kernel,
        out_shape=jax.ShapeDtypeStruct((N, D_out), out_dtype),
        grid=(n_tiles,),
        in_specs=[
            pl.BlockSpec(memory_space=pltpu.SMEM),              # BN scale a
            pl.BlockSpec((tile_n, D_in), lambda i: (i, 0)),     # x row tile
            pl.BlockSpec((D_in, D_out), lambda i: (0, 0)),      # W^T (resident)
            pl.BlockSpec((1, D_out), lambda i: (0, 0)),         # folded shift
        ],
        out_specs=pl.BlockSpec((tile_n, D_out), lambda i: (i, 0)),
        compiler_params=pltpu.CompilerParams(
            dimension_semantics=("parallel",),                  # megacore on v7x
            vmem_limit_bytes=_VMEM_LIMIT_BYTES),
    )(a.reshape(1), x2d, wt, shift)

    return out.reshape(N, 1, D_out)


if __name__ == "__main__":
    # Shapes consistent with the module: inputSize=16, outputSize=32, batch=8.
    N, D_in, D_out = 8, 16, 32

    key = jax.random.PRNGKey(0)
    kx, kw, kb, kx2, kx3 = jax.random.split(key, 5)

    # Input (N, C=1, inputSize), matching torch's NCL convention for BatchNorm1d.
    x = jax.random.normal(kx, (N, 1, D_in), dtype=jnp.float32)

    # BatchNorm1d defaults: gamma = 1, beta = 0 (single channel).
    gamma = jnp.ones((1,), jnp.float32)
    beta = jnp.zeros((1,), jnp.float32)
    # Linear init: uniform(-1/sqrt(D_in), 1/sqrt(D_in)).
    bound = 1.0 / (D_in ** 0.5)
    w = jax.random.uniform(kw, (D_out, D_in), jnp.float32, -bound, bound)
    b = jax.random.uniform(kb, (D_out,), jnp.float32, -bound, bound)

    # One-time parameter prep (transpose / colsum) outside the hot path.
    wt, csum, bias = prepare_linear_params(w, b)

    def torch_ref(x_ncl, g, be):
        n = x_ncl.shape[0]
        x2 = x_ncl.reshape(n, D_in)
        mean = jnp.mean(x2)
        var = jnp.mean((x2 - mean) ** 2)       # biased var (torch train mode)
        xn = (x2 - mean) / jnp.sqrt(var + BN_EPS) * g[0] + be[0]
        return (xn @ w.T + b).reshape(n, 1, D_out)

    # 1) Small batch -> fused single-block kernel.
    out = linear_regression_forward(x, gamma, beta, wt, csum, bias)
    jax.block_until_ready(out)
    assert out.shape == (N, 1, D_out)
    assert jnp.allclose(out, torch_ref(x, gamma, beta), atol=1e-4, rtol=1e-4)

    # 2) Row-tiled two-pass path (forced small tile for speed), with
    #    non-trivial gamma/beta to cover the folded affine.  Divisible batch.
    gamma2 = jnp.full((1,), 0.75, jnp.float32)
    beta2 = jnp.full((1,), 0.10, jnp.float32)
    N2 = 512
    x2 = jax.random.normal(kx2, (N2, 1, D_in), dtype=jnp.float32)
    out2 = linear_regression_forward(x2, gamma2, beta2, wt, csum, bias,
                                     row_tile=64)
    jax.block_until_ready(out2)
    assert out2.shape == (N2, 1, D_out)
    assert jnp.allclose(out2, torch_ref(x2, gamma2, beta2), atol=1e-4, rtol=1e-4)

    # 3) Ragged batch (N not a multiple of the row tile): exercises the masked
    #    statistics and the clipped final output block (no HBM-side padding).
    N3 = 200
    x3 = jax.random.normal(kx3, (N3, 1, D_in), dtype=jnp.float32)
    out3 = linear_regression_forward(x3, gamma2, beta2, wt, csum, bias,
                                     row_tile=64)
    jax.block_until_ready(out3)
    assert out3.shape == (N3, 1, D_out)
    assert jnp.allclose(out3, torch_ref(x3, gamma2, beta2), atol=1e-4, rtol=1e-4)

    print("KERNEL_OK")
</pallas_src>

<mosaic_0001>
module attributes {stable_mosaic.version = 11 : i64} {
  func.func @_fused_bn_linear_kernel(%arg0: memref<3xf32, #tpu.memory_space<smem>>, %arg1: memref<8x16xf32, #tpu.memory_space<vmem>>, %arg2: memref<16x32xf32, #tpu.memory_space<vmem>>, %arg3: memref<1x32xf32, #tpu.memory_space<vmem>>, %arg4: memref<1x32xf32, #tpu.memory_space<vmem>>, %arg5: memref<8x32xf32, #tpu.memory_space<vmem>>) attributes {dimension_semantics = [], scalar_prefetch = 0 : i64, scratch_operands = 0 : i64, tpu.core_type = #tpu.core_type<tc>} {
    %c0 = arith.constant 0 : index
    %0 = memref.load %arg0[%c0] : memref<3xf32, #tpu.memory_space<smem>>
    %c1 = arith.constant 1 : index
    %1 = memref.load %arg0[%c1] : memref<3xf32, #tpu.memory_space<smem>>
    %c2 = arith.constant 2 : index
    %2 = memref.load %arg0[%c2] : memref<3xf32, #tpu.memory_space<smem>>
    %c0_0 = arith.constant 0 : index
    %c0_1 = arith.constant 0 : index
    %3 = vector.load %arg1[%c0_0, %c0_1] : memref<8x16xf32, #tpu.memory_space<vmem>>, vector<8x16xf32>
    %c0_2 = arith.constant 0 : index
    %c0_3 = arith.constant 0 : index
    %4 = vector.load %arg2[%c0_2, %c0_3] : memref<16x32xf32, #tpu.memory_space<vmem>>, vector<16x32xf32>
    %cst = arith.constant dense<0.000000e+00> : vector<8x32xf32>
    %5 = tpu.matmul %3, %4, %cst {dimension_numbers = #tpu.dot_dimension_numbers<[1], [0], [0], [1], [0, 0, 1, 1], [], []>} : vector<8x16xf32>, vector<16x32xf32>, vector<8x32xf32> -> vector<8x32xf32>
    %6 = vector.shape_cast %3 : vector<8x16xf32> to vector<1x8x16xf32>
    %cst_4 = arith.constant dense<0.000000e+00> : vector<1xf32>
    %7 = vector.multi_reduction <add>, %6, %cst_4 [1, 2] : vector<1x8x16xf32> to vector<1xf32>
    %8 = vector.shape_cast %7 : vector<1xf32> to vector<1x1x1xf32>
    %9 = vector.extract %8[0, 0, 0] : f32 from vector<1x1x1xf32>
    %10 = arith.mulf %9, %2 : f32
    %11 = vector.broadcast %10 : f32 to vector<8x16xf32>
    %12 = arith.subf %3, %11 : vector<8x16xf32>
    %13 = arith.mulf %12, %12 : vector<8x16xf32>
    %14 = vector.shape_cast %13 : vector<8x16xf32> to vector<1x8x16xf32>
    %cst_5 = arith.constant dense<0.000000e+00> : vector<1xf32>
    %15 = vector.multi_reduction <add>, %14, %cst_5 [1, 2] : vector<1x8x16xf32> to vector<1xf32>
    %16 = vector.shape_cast %15 : vector<1xf32> to vector<1x1x1xf32>
    %17 = vector.extract %16[0, 0, 0] : f32 from vector<1x1x1xf32>
    %18 = arith.mulf %17, %2 : f32
    %cst_6 = arith.constant 9.99999974E-6 : f32
    %19 = arith.addf %18, %cst_6 : f32
    %20 = math.rsqrt %19 : f32
    %21 = arith.mulf %0, %20 : f32
    %22 = arith.mulf %10, %21 : f32
    %23 = arith.subf %1, %22 : f32
    %24 = vector.broadcast %21 : f32 to vector<8x32xf32>
    %25 = arith.mulf %5, %24 : vector<8x32xf32>
    %c0_7 = arith.constant 0 : index
    %c0_8 = arith.constant 0 : index
    %26 = vector.load %arg3[%c0_7, %c0_8] : memref<1x32xf32, #tpu.memory_space<vmem>>, vector<1x32xf32>
    %27 = vector.broadcast %23 : f32 to vector<1x32xf32>
    %28 = arith.mulf %27, %26 : vector<1x32xf32>
    %c0_9 = arith.constant 0 : index
    %c0_10 = arith.constant 0 : index
    %29 = vector.load %arg4[%c0_9, %c0_10] : memref<1x32xf32, #tpu.memory_space<vmem>>, vector<1x32xf32>
    %30 = arith.addf %28, %29 : vector<1x32xf32>
    %31 = vector.broadcast %30 : vector<1x32xf32> to vector<8x32xf32>
    %32 = arith.addf %25, %31 : vector<8x32xf32>
    %c0_11 = arith.constant 0 : index
    %c0_12 = arith.constant 0 : index
    %33 = vector.load %arg5[%c0_11, %c0_12] : memref<8x32xf32, #tpu.memory_space<vmem>>, vector<8x32xf32>
    tpu.vector_store %arg5[%c0_11, %c0_12], %32 {strides = array<i32>} : memref<8x32xf32, #tpu.memory_space<vmem>>, vector<8x32xf32>,
    return
  }
}

</mosaic_0001>

<bundles_post_ra>
// kernel: linear_regression_forward.1
= control target key start
LH: loop header
LB: loop body
LE: loop exit
PB: predicated region body
PF: predicated region fallthrough
CT: control target
= control target key end

     0   :  { %10 = vsyncpa [#allocation5], 0  ;;  %s364_s0 = inlined_call_operand.vmem [shape: f32[3], index: 0, kind: input, shape index: {}]   ;;  %s365_s1 = inlined_call_operand.hbm [shape: f32[8,16], index: 1, kind: input, shape index: {}]   ;;  %s366_s2 = inlined_call_operand.vmem [shape: f32[16,32], index: 2, kind: input, shape index: {}]   ;;  %s367_s3 = inlined_call_operand.vmem [shape: f32[1,32], index: 3, kind: input, shape index: {}]   ;;  %s368_s4 = inlined_call_operand.vmem [shape: f32[1,32], index: 4, kind: input, shape index: {}]   ;;  %s369_s5 = inlined_call_operand.hbm [shape: f32[8,32], index: 5, kind: output, shape index: {}]  }
   0x1   :  { %11 = vsyncpa [#allocation3], 0 }
   0x2   :  { %12 = vsyncpa [#allocation4], 0  ;;  %s19_s20 = sshll.u32 %s364_s0, 4  ;;  %s20_s20 = int_to_ptr.vmem [resolvable:$true] %s19_s20 }
   0x3   :  { %s220_s21 = scalar_lea.vmem %s20_s20, 16  ;;  %p225_p1 = scmp.lt.s32.totalorder %s20_s20, %s20_s20 }
   0x4   :  { %p221_p0 = scmp.ne.s32.totalorder %s20_s20, %s220_s21  ;;  %p226_p2 = scmp.lt.s32.totalorder %s220_s21, %s220_s21 }
   0x6   :  { %p227_p3 = por %p226_p2, %p225_p1 }
   0x8   :  { %p228_p4 = pnand %p227_p3, %p221_p0 }
   0xa   :  { %231 = shalt.err (!%p228_p4)
}
   0xb   :  { %s282_s22 = smov [#allocation2]   ;;  %s283_s23 = smov [#allocation6]  }
   0xc   :  { %22 = dma.vmem_to_smem %s20_s20, 16, %s282_s22, [#allocation5]  }
   0xd   :  { %s29_s24 = sshll.u32 %s283_s23, 4  ;;  %s232_s27 = scalar_lea.hbm %s365_s1, 128  ;;  %s30_s24 = int_to_ptr.vmem [resolvable:$true] %s29_s24 }
   0xe   :  { %p233_p5 = scmp.ne.s32.totalorder %s365_s1, %s232_s27  ;;  %p236_p6 = scmp.lt.u32.totalorder %s232_s27, %s365_s1 }
  0x10   :  { %p238_p7 = pnand %p236_p6, %p233_p5 }
  0x12   :  { %241 = shalt.err (!%p238_p7)
}
  0x13   :  { %s242_s6 = scalar_lea.vmem %s30_s24, 128  ;;  %p247_p9 = scmp.lt.s32.totalorder %s30_s24, %s30_s24 }
  0x14   :  { %p243_p8 = scmp.ne.s32.totalorder %s30_s24, %s242_s6  ;;  %p248_p10 = scmp.lt.s32.totalorder %s242_s6, %s242_s6 }
  0x16   :  { %p249_p11 = por %p248_p10, %p247_p9 }
  0x18   :  { %p250_p12 = pnand %p249_p11, %p243_p8 }
  0x1a   :  { %253 = shalt.err (!%p250_p12)
}
  0x1b   :  { %32 = dma.hbm_to_vmem [thread:$0]  %s365_s1, 128, %s30_s24, [#allocation3]  }
  0x1c   :  { %276 = dma.done.wait [#allocation5], 16  }
  0x1d   :  { %277 = vsyncadd [#allocation5], 4294967280 }
  0x1e   :  { %278 = dma.done.wait [#allocation3], 128  }
  0x1f   :  { %279 = vsyncadd [#allocation3], 4294967168 }
  0x20   :  { %45 = sfence }
  0x21   :  { %v49_v0 = vld [vmem:[#allocation6] sm:$0xff]  ;;  %vm52_vm0 = vcmask 130048   ;;  %v51_v3 = vld [vmem:[%s366_s2 + $0x8] sm:$0xff]  ;;  %v284_v4 = vmov 0.0|0.0   ;;  %vm285_vm1 = vmmov 0   ;;  %v286_v6 = vmov 0.0  }
  0x22   :  { %v126_v1 = vsel %vm52_vm0, %v49_v0, 0.0  ;;  %v50_v2 = vld [vmem:[%s366_s2] sm:$0xff]  ;;  %203 = vmatprep.subr.bf16.mxu0 %v284_v4  ;;  %200 = vmatprep.mubr.msk.f32.mxu0 %vm285_vm1, %v286_v6  ;;  %s191_s1 = sld [smem:[#allocation2 + $0x2]]  ;;  %s46_s17 = sld [smem:[#allocation2]]  ;;  %v166_v29 = vlaneseq  ;;  %vm172_vm2 = vcmask 261120  }
  0x23   :  { %127 = vadd.xlane.f32.xlu0 %v126_v1  ;;  %v204_v5 = vpack.c.bf16 %v51_v3, %v50_v2  ;;  %s190_s18 = sld [smem:[#allocation2 + $0x1]]  ;;  %v160_v31 = vld [vmem:[%s367_s3] sm:$0x1]  ;;  %s287_s27 = smov [#allocation7]  }
  0x24   :  { %v167_v30 = vshrl.u32 %v166_v29, 7  ;;  %v163_v33 = vld [vmem:[%s368_s4] sm:$0x1]  ;;  %s180_s28 = sshll.u32 %s287_s27, 4  ;;  %s181_s28 = int_to_ptr.vmem [resolvable:$true] %s180_s28 }
  0x25   :  { %205 = vmatpush3.bf16.msra.mxu0 %v204_v5  ;;  %s254_s29 = scalar_lea.vmem %s181_s28, 128  ;;  %p259_p0 = scmp.lt.s32.totalorder %s181_s28, %s181_s28 }
  0x26   :  { %v168_v35 = vsub.s32 0, %v167_v30  ;;  %p255_p13 = scmp.ne.s32.totalorder %s181_s28, %s254_s29  ;;  %p260_p1 = scmp.lt.s32.totalorder %s254_s29, %s254_s29 }
  0x28   :  { %201 = vmatmul.mubr.msk.f32.vlgmr.msra.gmra.mrb[0].mxu0 %vm52_vm0, %v49_v0  ;;  %p261_p2 = por %p260_p1, %p259_p0 }
  0x2a   :  { %p262_p3 = pnand %p261_p2, %p255_p13 }
  0xb0   :  { %v128_v7 = vpop.xlane.xlu0 %127 }
  0xb1   :  { %v129_v8 = vrot.slane %v128_v7, 4 }
  0xb3   :  { %v130_v9 = vadd.f32 %v129_v8, %v128_v7 }
  0xb5   :  { %v131_v10 = vrot.slane %v130_v9, 2 }
  0xb7   :  { %v132_v11 = vadd.f32 %v131_v10, %v130_v9 }
  0xb9   :  { %v133_v12 = vrot.slane %v132_v11, 1 }
  0xbb   :  { %v134_v13 = vadd.f32 %v133_v12, %v132_v11 }
  0xbd   :  { %206 = vpush %v134_v13 }
  0xee   :  { %s207_s13 = spop %206 }
  0xef   :  { %s341_s2 = smul.f32 %s207_s13, %s191_s1 }
  0xf1   :  { %v137_v14 = vstv %s341_s2 }
  0xf2   :  { %v138_v15 = vsub.f32 %v49_v0, %v137_v14 }
  0xf4   :  { %v139_v16 = vmul.f32 %v138_v15, %v138_v15 }
  0xf6   :  { %v140_v17 = vsel %vm52_vm0, %v139_v16, 0.0 }
  0xf7   :  { %141 = vadd.xlane.f32.xlu0 %v140_v17 }
  0xfb   :  { %v122_v21 = vpop.f32.mrb[0].mxu0 }
  0xfc   :  { %v202_v22 = vpop.f32.mrb[1].mxu0 }
 0x184   :  { %v142_v18 = vpop.xlane.xlu0 %141 }
 0x185   :  { %v143_v19 = vrot.slane %v142_v18, 4 }
 0x187   :  { %v144_v20 = vadd.f32 %v143_v19, %v142_v18 }
 0x189   :  { %v145_v23 = vrot.slane %v144_v20, 2 }
 0x18b   :  { %v146_v24 = vadd.f32 %v145_v23, %v144_v20 }
 0x18d   :  { %v147_v25 = vrot.slane %v146_v24, 1 }
 0x18f   :  { %v148_v26 = vadd.f32 %v147_v25, %v146_v24 }
 0x191   :  { %208 = vpush %v148_v26 }
 0x1c2   :  { %s209_s14 = spop %208 }
 0x1c3   :  { %s150_s15 = smul.f32 %s209_s14, %s191_s1 }
 0x1c5   :  { %s151_s16 = sadd.f32 1e-05, %s150_s15 }
 0x1c7   :  { %v152_v27 = vstv %s151_s16 }
 0x1c8   :  { %218 = vrsqrt.f32 %v152_v27 }
 0x1d2   :  { %v219_v28 = vpop.eup %218 }
 0x1d3   :  { %210 = vpush %v219_v28 }
 0x204   :  { %s211_s19 = spop %210 }
 0x205   :  { %s155_s20 = smul.f32 %s211_s19, %s46_s17 }
 0x207   :  { %s156_s21 = smul.f32 %s155_s20, %s341_s2  ;;  %v158_v36 = vstv %s155_s20 }
 0x208   :  { %v159_v38 = vmul.f32 %v158_v36, %v122_v21 }
 0x209   :  { %s157_s22 = ssub.f32 %s190_s18, %s156_s21 }
 0x20b   :  { %v161_v32 = vstv %s157_s22 }
 0x20c   :  { %v162_v34 = vmul.f32 %v161_v32, %v160_v31 }
 0x20e   :  { %v164_v37 = vadd.f32 %v163_v33, %v162_v34 }
 0x210   :  { %v169_v39 = vrot.slane %v164_v37, %v168_v35 }
 0x212   :  { %v171_v40 = vadd.f32 %v169_v39, %v159_v38 }
 0x214   :  { %173 = vst.msk [vmem:[#allocation7] sm:$0xff] %vm172_vm2, %v171_v40 }
 0x215   :  { %265 = shalt.err (!%p262_p3)
}
 0x216   :  { %s266_s0 = scalar_lea.hbm %s369_s5, 128 }
 0x217   :  { %p267_p4 = scmp.ne.s32.totalorder %s369_s5, %s266_s0  ;;  %p270_p5 = scmp.lt.u32.totalorder %s266_s0, %s369_s5 }
 0x219   :  { %p272_p6 = pnand %p270_p5, %p267_p4 }
 0x21b   :  { %275 = shalt.err (!%p272_p6)
}
 0x21c   :  { %183 = dma.vmem_to_hbm [thread:$0]  %s181_s28, 128, %s369_s5, [#allocation4]  }
 0x21d   :  { %280 = dma.done.wait [#allocation4], 128  }
 0x21e   :  { %281 = vsyncadd [#allocation4], 4294967168 }
 0x21f   :  { %187 = vsyncpa [#allocation3], 1 }
 0x220   :  { %188 = vsyncpa [#allocation4], 1 }
 0x221   :  { %189 = vsyncpa [#allocation5], 1 }

</bundles_post_ra>
